<compile_context>
chip_gen: v7x
topology: tpu7x:2x2x1
jax: 0.10.0
libtpu: 0.0.40
codegen_flags: <defaults>
</compile_context>

<pallas_src>
import jax
import jax.numpy as jnp
import numpy as np
from jax import lax
from jax.experimental import pallas as pl
from jax.experimental.pallas import tpu as pltpu

LEAKY_SLOPE = 0.01          # F.leaky_relu default negative_slope
OUT_WIDTH = 128             # lane-dense output slab width (multiple of 128)
_MAX_TB = 1024              # batch tile: ~2 MiB double-buffered, fits every gen

# Static column layout of the fused output slab
COL_ANOM_LO, COL_ANOM_HI = 0, 1          # anomaly score            [B, 1]
COL_DOM_LO,  COL_DOM_HI  = 1, 4          # domain classification    [B, 3]
COL_DC_LO = 4                            # domain classifier starts here


# ----------------------------------------------------------------------------
# Kernels
# ----------------------------------------------------------------------------
def _semiadnet_heads_kernel(x128_ref, x64_ref, w1_ref, wtail_ref, o_ref):
    """All three heads, one batch tile.

    x128_ref : [TB, 128] bf16   shared input of both MLP heads
    x64_ref  : [TB, 64]  bf16   input of the weight-norm domain classifier
    w1_ref   : [128, 64] bf16   concat of anom_w1 (cols 0:32) and dom_w1 (32:64)
    wtail_ref: [128, 128] bf16  rows 0:32  cols 0:1 = anom_w2
                                rows 32:64 cols 1:4 = dom_w2
                                rows 64:128 cols 4:4+dc = (v/||v||).T
    o_ref    : [TB, 128] f32    lane-dense output slab
    """
    # Layer 1 of both MLP heads fused: one [TB,128] x [128,64] matmul, f32 acc.
    h = jnp.dot(x128_ref[...], w1_ref[...], preferred_element_type=jnp.float32)
    h = jnp.maximum(h, LEAKY_SLOPE * h)                       # leaky_relu (f32)

    # Merged tail matmul (K=128): [leaky(h) | x64] x W_tail.  Zero blocks in
    # W_tail keep the heads independent; classifier lanes see only x64 terms.
    lhs = jnp.concatenate([h.astype(jnp.bfloat16), x64_ref[...]], axis=-1)
    y = jnp.dot(lhs, wtail_ref[...], preferred_element_type=jnp.float32)

    # leaky_relu only on the MLP-head lanes (< COL_DC_LO); classifier lanes
    # (no activation in the reference model) pass through untouched.
    lane = lax.broadcasted_iota(jnp.int32, y.shape, 1)
    o_ref[...] = jnp.where(lane < COL_DC_LO,
                           jnp.maximum(y, LEAKY_SLOPE * y), y)


def _mlp_head_kernel(x_ref, w1_ref, w2pad_ref, o_ref):
    """Single 2-layer MLP head: leaky(leaky(x @ w1) @ w2pad), lane-dense out."""
    h = jnp.dot(x_ref[...], w1_ref[...], preferred_element_type=jnp.float32)
    h = jnp.maximum(h, LEAKY_SLOPE * h)
    y = jnp.dot(h.astype(jnp.bfloat16), w2pad_ref[...],
                preferred_element_type=jnp.float32)
    o_ref[...] = jnp.maximum(y, LEAKY_SLOPE * y)


def _linear_head_kernel(x_ref, wpad_ref, o_ref):
    """Weight-norm classifier head (no activation), lane-dense out."""
    o_ref[...] = jnp.dot(x_ref[...], wpad_ref[...],
                         preferred_element_type=jnp.float32)


# ----------------------------------------------------------------------------
# Row-tiled launcher (batch grid, resident weights, padded batch)
# ----------------------------------------------------------------------------
def _padded_batch(B):
    """Return (padded_B, tile_rows)."""
    if B <= _MAX_TB:
        bp = max(16, ((B + 15) // 16) * 16)     # bf16 sublane packing
        return bp, bp                            # single full-array tile
    bp = ((B + _MAX_TB - 1) // _MAX_TB) * _MAX_TB
    return bp, _MAX_TB


def _pad_rows(x, bp):
    b = x.shape[0]
    return x if b == bp else jnp.pad(x, ((0, bp - b), (0, 0)))


def _launch_rowtiled(kernel, acts, weights, cost_estimate=None):
    """acts: [B, D] arrays, row-tiled & bf16-cast.  weights: small 2D arrays,
    DMA'd once (index_map -> (0, 0)) and VMEM-resident across the grid."""
    B = acts[0].shape[0]
    bp, tb = _padded_batch(B)
    acts = [_pad_rows(a.astype(jnp.bfloat16), bp) for a in acts]
    in_specs = (
        [pl.BlockSpec((tb, a.shape[1]), lambda i: (i, 0)) for a in acts]
        + [pl.BlockSpec(w.shape, lambda i: (0, 0)) for w in weights])
    out = pl.pallas_call(
        kernel,
        out_shape=jax.ShapeDtypeStruct((bp, OUT_WIDTH), jnp.float32),
        grid_spec=pltpu.PrefetchScalarGridSpec(
            num_scalar_prefetch=0,
            grid=(pl.cdiv(bp, tb),),
            in_specs=in_specs,
            out_specs=pl.BlockSpec((tb, OUT_WIDTH), lambda i: (i, 0)),
        ),
        compiler_params=pltpu.CompilerParams(
            dimension_semantics=("parallel",)),
        cost_estimate=cost_estimate,
    )(*acts, *weights)
    return out[:B]


def semiadnet_heads(feat128, feat64, w1_packed, w_tail):
    """Fused call: all three heads into one [B, 128] lane-dense slab."""
    B = feat128.shape[0]
    cost = pl.CostEstimate(
        flops=2 * B * (128 * 64 + 128 * 128),
        transcendentals=0,
        bytes_accessed=B * (128 * 2 + 64 * 2 + 128 * 4)
        + (w1_packed.size + w_tail.size) * 2)
    return _launch_rowtiled(_semiadnet_heads_kernel,
                            [feat128, feat64], [w1_packed, w_tail], cost)


# ----------------------------------------------------------------------------
# SemiADNet parameter container (deterministic synthetic init + weight packing)
# ----------------------------------------------------------------------------
class SemiADNetPallas:
    def __init__(self, key, domain_cnt=3):
        assert COL_DC_LO + domain_cnt <= OUT_WIDTH
        self.domain_cnt = domain_cnt
        k = jax.random.split(key, 5)

        # Raw f32 weights, stored transposed to [in, out] for y = x @ W
        # (torch nn.Linear stores [out, in]).
        self.anom_w1 = 0.1 * jax.random.normal(k[0], (128, 32), jnp.float32)
        self.anom_w2 = 0.1 * jax.random.normal(k[1], (32, 1), jnp.float32)
        self.dom_w1 = 0.1 * jax.random.normal(k[2], (128, 32), jnp.float32)
        self.dom_w2 = 0.1 * jax.random.normal(k[3], (32, 3), jnp.float32)
        # weight_norm(nn.Linear(64, domain_cnt, bias=False)) direction v,
        # torch layout [out, in]; weight_g frozen at 1.
        self.dc_v = 0.1 * jax.random.normal(k[4], (domain_cnt, 64), jnp.float32)

        # weight_norm with g == 1: W = v / ||v_row||, transposed for x @ W.
        inv_norm = 1.0 / jnp.sqrt(jnp.sum(self.dc_v * self.dc_v, axis=1,
                                          keepdims=True))
        wn = (self.dc_v * inv_norm).T                        # [64, domain_cnt]

        # ---- fused-kernel packing (bf16 MXU operands) -----------------------
        self.w1_packed = jnp.concatenate(
            [self.anom_w1, self.dom_w1], axis=1).astype(jnp.bfloat16)  # [128,64]

        w_tail = jnp.zeros((128, OUT_WIDTH), jnp.float32)
        w_tail = w_tail.at[:32, COL_ANOM_LO:COL_ANOM_HI].set(self.anom_w2)
        w_tail = w_tail.at[32:64, COL_DOM_LO:COL_DOM_HI].set(self.dom_w2)
        w_tail = w_tail.at[64:128, COL_DC_LO:COL_DC_LO + domain_cnt].set(wn)
        self.w_tail = w_tail.astype(jnp.bfloat16)            # [128, 128]

        # ---- per-head packings (dedicated kernels, no zero placeholders) ----
        self.anom_w1_bf = self.anom_w1.astype(jnp.bfloat16)
        self.dom_w1_bf = self.dom_w1.astype(jnp.bfloat16)
        self.anom_w2_pad = (jnp.zeros((32, OUT_WIDTH), jnp.float32)
                            .at[:, 0:1].set(self.anom_w2)).astype(jnp.bfloat16)
        self.dom_w2_pad = (jnp.zeros((32, OUT_WIDTH), jnp.float32)
                           .at[:, 0:3].set(self.dom_w2)).astype(jnp.bfloat16)
        self.wn_pad = (jnp.zeros((64, OUT_WIDTH), jnp.float32)
                       .at[:, 0:domain_cnt].set(wn)).astype(jnp.bfloat16)

    # Fused forward of all defined heads — one kernel launch.
    def heads(self, feat128, feat64):
        out = semiadnet_heads(feat128, feat64, self.w1_packed, self.w_tail)
        anomaly = out[:, COL_ANOM_LO:COL_ANOM_HI]                # [B, 1]
        dom_cls = out[:, COL_DOM_LO:COL_DOM_HI]                  # [B, 3]
        dom_out = out[:, COL_DC_LO:COL_DC_LO + self.domain_cnt]  # [B, dc]
        return anomaly, dom_cls, dom_out

    # API-compatible per-head methods — dedicated small kernels so no dead
    # zero-placeholder DMA / matmuls on the single-head paths.
    def calc_anomaly(self, x):               # x: [B, 128] -> [B, 1]
        out = _launch_rowtiled(_mlp_head_kernel, [x],
                               [self.anom_w1_bf, self.anom_w2_pad])
        return out[:, 0:1]

    def domain_classification(self, x):      # x: [B, 128] -> [B, 3]
        out = _launch_rowtiled(_mlp_head_kernel, [x],
                               [self.dom_w1_bf, self.dom_w2_pad])
        return out[:, 0:3]

    def domain_classifier(self, x):          # x: [B, 64] -> [B, domain_cnt]
        out = _launch_rowtiled(_linear_head_kernel, [x], [self.wn_pad])
        return out[:, 0:self.domain_cnt]


# ----------------------------------------------------------------------------
# Pure-JAX f32 references for verification (raw, un-packed weights)
# ----------------------------------------------------------------------------
def _leaky(x):
    return jnp.where(x >= 0, x, LEAKY_SLOPE * x)


def _ref_mlp2(x, w1, w2):
    return _leaky(_leaky(x @ w1) @ w2)


def _ref_wn(x, v):
    w = v / jnp.sqrt(jnp.sum(v * v, axis=1, keepdims=True))
    return x @ w.T


if __name__ == "__main__":
    key = jax.random.PRNGKey(0)
    kmodel, kx128, kx64 = jax.random.split(key, 3)

    model = SemiADNetPallas(kmodel, domain_cnt=3)

    B = 8
    feat128 = jax.random.normal(kx128, (B, 128), jnp.float32)
    feat64 = jax.random.normal(kx64, (B, 64), jnp.float32)

    # One fused kernel launch computes all three heads.
    anomaly, dom_cls, dom_out = model.heads(feat128, feat64)
    jax.block_until_ready((anomaly, dom_cls, dom_out))

    # bf16 MXU operands (f32 accumulation) -> loosened tolerances vs f32 refs.
    TOL = dict(rtol=3e-2, atol=3e-2)
    ref_anom = _ref_mlp2(feat128, model.anom_w1, model.anom_w2)
    ref_dom = _ref_mlp2(feat128, model.dom_w1, model.dom_w2)
    ref_dc = _ref_wn(feat64, model.dc_v)

    np.testing.assert_allclose(np.asarray(anomaly), np.asarray(ref_anom), **TOL)
    np.testing.assert_allclose(np.asarray(dom_cls), np.asarray(ref_dom), **TOL)
    np.testing.assert_allclose(np.asarray(dom_out), np.asarray(ref_dc), **TOL)

    # Per-head API-compatible methods (dedicated kernels).
    np.testing.assert_allclose(np.asarray(model.calc_anomaly(feat128)),
                               np.asarray(ref_anom), **TOL)
    np.testing.assert_allclose(np.asarray(model.domain_classification(feat128)),
                               np.asarray(ref_dom), **TOL)
    np.testing.assert_allclose(np.asarray(model.domain_classifier(feat64)),
                               np.asarray(ref_dc), **TOL)

    print("KERNEL_OK")
</pallas_src>

<mosaic_0001>
module attributes {stable_mosaic.version = 11 : i64} {
  func.func @_semiadnet_heads_kernel(%arg0: i32, %arg1: memref<16x128xbf16, #tpu.memory_space<vmem>>, %arg2: memref<16x64xbf16, #tpu.memory_space<vmem>>, %arg3: memref<128x64xbf16, #tpu.memory_space<vmem>>, %arg4: memref<128x128xbf16, #tpu.memory_space<vmem>>, %arg5: memref<16x128xf32, #tpu.memory_space<vmem>>) attributes {dimension_semantics = [#tpu.dimension_semantics<parallel>], iteration_bounds = array<i64: 1>, scalar_prefetch = 0 : i64, scratch_operands = 0 : i64, tpu.core_type = #tpu.core_type<tc>, window_params = [{transform_indices = @transform_0, window_bounds = array<i64: 16, 128>}, {transform_indices = @transform_1, window_bounds = array<i64: 16, 64>}, {pipeline_mode = #tpu.pipeline_mode<synchronous>, transform_indices = @transform_2, window_bounds = array<i64: 128, 64>}, {pipeline_mode = #tpu.pipeline_mode<synchronous>, transform_indices = @transform_3, window_bounds = array<i64: 128, 128>}, {transform_indices = @transform_4, window_bounds = array<i64: 16, 128>}]} {
    %c0 = arith.constant 0 : index
    %c0_0 = arith.constant 0 : index
    %0 = vector.load %arg1[%c0, %c0_0] : memref<16x128xbf16, #tpu.memory_space<vmem>>, vector<16x128xbf16>
    %c0_1 = arith.constant 0 : index
    %c0_2 = arith.constant 0 : index
    %1 = vector.load %arg3[%c0_1, %c0_2] : memref<128x64xbf16, #tpu.memory_space<vmem>>, vector<128x64xbf16>
    %cst = arith.constant dense<0.000000e+00> : vector<16x64xf32>
    %2 = tpu.matmul %0, %1, %cst {dimension_numbers = #tpu.dot_dimension_numbers<[1], [0], [0], [1], [0, 0, 1, 1], [], []>} : vector<16x128xbf16>, vector<128x64xbf16>, vector<16x64xf32> -> vector<16x64xf32>
    %cst_3 = arith.constant 0.00999999977 : f32
    %3 = vector.broadcast %cst_3 : f32 to vector<16x64xf32>
    %4 = arith.mulf %3, %2 : vector<16x64xf32>
    %5 = arith.maximumf %2, %4 : vector<16x64xf32>
    %6 = arith.truncf %5 : vector<16x64xf32> to vector<16x64xbf16>
    %c0_4 = arith.constant 0 : index
    %c0_5 = arith.constant 0 : index
    %7 = vector.load %arg2[%c0_4, %c0_5] : memref<16x64xbf16, #tpu.memory_space<vmem>>, vector<16x64xbf16>
    %8 = tpu.concatenate %6, %7 in 1 : vector<16x64xbf16>, vector<16x64xbf16> -> vector<16x128xbf16>
    %c0_6 = arith.constant 0 : index
    %c0_7 = arith.constant 0 : index
    %9 = vector.load %arg4[%c0_6, %c0_7] : memref<128x128xbf16, #tpu.memory_space<vmem>>, vector<128x128xbf16>
    %cst_8 = arith.constant dense<0.000000e+00> : vector<16x128xf32>
    %10 = tpu.matmul %8, %9, %cst_8 {dimension_numbers = #tpu.dot_dimension_numbers<[1], [0], [0], [1], [0, 0, 1, 1], [], []>} : vector<16x128xbf16>, vector<128x128xbf16>, vector<16x128xf32> -> vector<16x128xf32>
    %11 = tpu.iota {dimensions = array<i32: 1>} : vector<16x128xi32>
    %c4_i32 = arith.constant 4 : i32
    %12 = vector.broadcast %c4_i32 : i32 to vector<16x128xi32>
    %13 = arith.cmpi slt, %11, %12 : vector<16x128xi32>
    %cst_9 = arith.constant 0.00999999977 : f32
    %14 = vector.broadcast %cst_9 : f32 to vector<16x128xf32>
    %15 = arith.mulf %14, %10 : vector<16x128xf32>
    %16 = arith.maximumf %10, %15 : vector<16x128xf32>
    %17 = arith.select %13, %16, %10 : vector<16x128xi1>, vector<16x128xf32>
    %c0_10 = arith.constant 0 : index
    %c0_11 = arith.constant 0 : index
    %18 = vector.load %arg5[%c0_10, %c0_11] : memref<16x128xf32, #tpu.memory_space<vmem>>, vector<16x128xf32>
    tpu.vector_store %arg5[%c0_10, %c0_11], %17 {strides = array<i32>} : memref<16x128xf32, #tpu.memory_space<vmem>>, vector<16x128xf32>,
    return
  }
  func.func @transform_0(%arg0: i32) -> (i32, i32) {
    %c0_i32 = arith.constant 0 : i32
    %c0_i32_0 = arith.constant 0 : i32
    return %arg0, %c0_i32 : i32, i32
  }
  func.func @transform_1(%arg0: i32) -> (i32, i32) {
    %c0_i32 = arith.constant 0 : i32
    %c0_i32_0 = arith.constant 0 : i32
    return %arg0, %c0_i32 : i32, i32
  }
  func.func @transform_2(%arg0: i32) -> (i32, i32) {
    %c0_i32 = arith.constant 0 : i32
    %c0_i32_0 = arith.constant 0 : i32
    %c0_i32_1 = arith.constant 0 : i32
    return %c0_i32, %c0_i32_0 : i32, i32
  }
  func.func @transform_3(%arg0: i32) -> (i32, i32) {
    %c0_i32 = arith.constant 0 : i32
    %c0_i32_0 = arith.constant 0 : i32
    %c0_i32_1 = arith.constant 0 : i32
    return %c0_i32, %c0_i32_0 : i32, i32
  }
  func.func @transform_4(%arg0: i32) -> (i32, i32) {
    %c0_i32 = arith.constant 0 : i32
    %c0_i32_0 = arith.constant 0 : i32
    return %arg0, %c0_i32 : i32, i32
  }
}

</mosaic_0001>

<bundles_post_ra>
// kernel: tpu_custom_call.1
= control target key start
LH: loop header
LB: loop body
LE: loop exit
PB: predicated region body
PF: predicated region fallthrough
CT: control target
= control target key end

     0   :  { %v407_v1 = vmov 0.0   ;;  %vm408_vm0 = vmmov 0   ;;  %s409_s27 = smov 64   ;;  %s504_s0 = inlined_call_operand.vmem [shape: bf16[16,128], index: 0, kind: input, shape index: {}]   ;;  %s505_s1 = inlined_call_operand.vmem [shape: bf16[16,64], index: 1, kind: input, shape index: {}]   ;;  %s506_s2 = inlined_call_operand.vmem [shape: bf16[128,64], index: 2, kind: input, shape index: {}]   ;;  %s507_s3 = inlined_call_operand.vmem [shape: bf16[128,128], index: 3, kind: input, shape index: {}]   ;;  %s508_s4 = inlined_call_operand.hbm [shape: f32[16,128], index: 4, kind: output, shape index: {}]  }
   0x1   :  { %v365_v0 = vld [vmem:[%s506_s2] sm:$0xff]   ;;  %319 = vmatprep.subr.bf16.mxu0 %v407_v1  ;;  %339 = vmatprep.subr.bf16.mxu1 %v407_v1  ;;  %v366_v2 = vld [vmem:[%s506_s2 + $0x8] sm:$0xff]   ;;  %v367_v3 = vld [vmem:[%s506_s2 + $0x10] sm:$0xff]  }
   0x2   :  { %320 = vmatpush3.bf16.msra.mxu0 %v365_v0  ;;  %335 = vmatprep.mubr.msk.bf16.mxu0 %vm408_vm0, %v407_v1  ;;  %v368_v4 = vld [vmem:[%s506_s2 + $0x18] sm:$0xff]   ;;  %v374_v5 = vld [vmem:[%s505_s1] sm:$0xff]   ;;  %v376_v7 = vld [vmem:[%s507_s3 + $0x8] sm:$0xff]  }
   0x3   :  { %321 = vmatprep.subr.bf16.mxu0 %v407_v1  ;;  %355 = vmatprep.mubr.msk.bf16.mxu1 %vm408_vm0, %v407_v1  ;;  %v375_v6 = vld [vmem:[%s507_s3] sm:$0xff]   ;;  %v377_v9 = vld [vmem:[%s507_s3 + $0x10] sm:$0xff]  }
   0x4   :  { %144 = vrot.lane.b32.xlu0 %v374_v5, %s409_s27  ;;  %340 = vmatpush3.bf16.msra.mxu1 %v375_v6  ;;  %v369_v8 = vld [vmem:[%s506_s2 + $0x20] sm:$0xff]  }
   0x5   :  { %341 = vmatprep.subr.bf16.mxu1 %v407_v1 }
   0x6   :  { %322 = vmatpush3.bf16.msra.mxu0 %v366_v2 }
   0x7   :  { %323 = vmatprep.subr.bf16.mxu0 %v407_v1 }
   0x8   :  { %342 = vmatpush3.bf16.msra.mxu1 %v376_v7 }
   0x9   :  { %343 = vmatprep.subr.bf16.mxu1 %v407_v1 }
   0xa   :  { %324 = vmatpush3.bf16.msra.mxu0 %v367_v3 }
   0xb   :  { %325 = vmatprep.subr.bf16.mxu0 %v407_v1 }
   0xe   :  { %326 = vmatpush3.bf16.msra.mxu0 %v368_v4 }
   0xf   :  { %327 = vmatprep.subr.bf16.mxu0 %v407_v1 }
  0x10   :  { %9 = vsyncpa [#allocation3], 0  ;;  %v370_v10 = vld [vmem:[%s506_s2 + $0x28] sm:$0xff]   ;;  %344 = vmatpush3.bf16.msra.mxu1 %v377_v9  ;;  %v378_v11 = vld [vmem:[%s507_s3 + $0x18] sm:$0xff]   ;;  %vm146_vm1 = vcmask 523264   ;;  %v256_v30 = vlaneseq }
  0x11   :  { %345 = vmatprep.subr.bf16.mxu1 %v407_v1  ;;  %v371_v12 = vld [vmem:[%s506_s2 + $0x30] sm:$0xff]   ;;  %v379_v13 = vld [vmem:[%s507_s3 + $0x20] sm:$0xff]   ;;  %v372_v14 = vld [vmem:[%s506_s2 + $0x38] sm:$0xff]  }
  0x12   :  { %328 = vmatpush3.bf16.msra.mxu0 %v369_v8  ;;  %v380_v15 = vld [vmem:[%s507_s3 + $0x28] sm:$0xff]   ;;  %v373_v16 = vld [vmem:[%s504_s0] sm:$0xff]   ;;  %v381_v17 = vld [vmem:[%s507_s3 + $0x30] sm:$0xff]   ;;  %v257_v31 = vand.u32 127, %v256_v30  ;;  %s410_s0 = smov [#allocation2]  }
  0x13   :  { %329 = vmatprep.subr.bf16.mxu0 %v407_v1  ;;  %v382_v18 = vld [vmem:[%s507_s3 + $0x38] sm:$0xff]   ;;  %s272_s3 = sshll.u32 %s410_s0, 4  ;;  %s273_s3 = int_to_ptr.vmem [resolvable:$true] %s272_s3 }
  0x14   :  { %346 = vmatpush3.bf16.msra.mxu1 %v378_v11  ;;  %vm258_vm2 = vcmp.lt.s32.totalorder %v257_v31, 4  ;;  %s383_s24 = scalar_lea.vmem %s273_s3, 256  ;;  %p388_p1 = scmp.lt.s32.totalorder %s273_s3, %s273_s3 }
  0x15   :  { %347 = vmatprep.subr.bf16.mxu1 %v407_v1  ;;  %p384_p0 = scmp.ne.s32.totalorder %s273_s3, %s383_s24  ;;  %p389_p2 = scmp.lt.s32.totalorder %s383_s24, %s383_s24 }
  0x16   :  { %330 = vmatpush3.bf16.msra.mxu0 %v370_v10 }
  0x17   :  { %331 = vmatprep.subr.bf16.mxu0 %v407_v1  ;;  %p390_p3 = por %p389_p2, %p388_p1 }
  0x18   :  { %348 = vmatpush3.bf16.msra.mxu1 %v379_v13 }
  0x19   :  { %349 = vmatprep.subr.bf16.mxu1 %v407_v1  ;;  %p391_p4 = pnand %p390_p3, %p384_p0 }
  0x1a   :  { %332 = vmatpush3.bf16.msra.mxu0 %v371_v12 }
  0x1b   :  { %333 = vmatprep.subr.bf16.mxu0 %v407_v1 }
  0x1c   :  { %350 = vmatpush3.bf16.msra.mxu1 %v380_v15 }
  0x1d   :  { %351 = vmatprep.subr.bf16.mxu1 %v407_v1 }
  0x1e   :  { %334 = vmatpush3.bf16.msra.mxu0 %v372_v14 }
  0x20   :  { %352 = vmatpush3.bf16.msra.mxu1 %v381_v17 }
  0x21   :  { %336 = vmatmul.mubr.bf16.vlgmr.msra.gmra.mrb[0].mxu0 %v373_v16  ;;  %353 = vmatprep.subr.bf16.mxu1 %v407_v1 }
  0x24   :  { %354 = vmatpush3.bf16.msra.mxu1 %v382_v18 }
  0x76   :  { %v145_v27 = vpop.permute.xlu0 %144 }
  0xf4   :  { %v125_v19 = vpop.f32.mrb[0].mxu0 }
  0xf5   :  { %v132_v20 = vmul.f32 0.01, %v125_v19  ;;  %v337_v21 = vpop.f32.mrb[1].mxu0 }
  0xf6   :  { %v128_v22 = vpop.f32.mrb[2].mxu0 }
  0xf7   :  { %v133_v23 = vmul.f32 0.01, %v128_v22  ;;  %v338_v24 = vpop.f32.mrb[3].mxu0  ;;  %v134_v25 = vmax.f32 %v125_v19, %v132_v20 }
  0xf9   :  { %v135_v26 = vmax.f32 %v128_v22, %v133_v23 }
  0xfb   :  { %v136_v28 = vpack.c.bf16 %v135_v26, %v134_v25 }
  0xfd   :  { %v149_v29 = vsel %vm146_vm1, %v136_v28, %v145_v27 }
  0xfe   :  { %356 = vmatmul.mubr.bf16.vlgmr.msra.gmra.mrb[0].mxu1 %v149_v29 }
 0x1d1   :  { %v249_v32 = vpop.f32.mrb[0].mxu1 }
 0x1d2   :  { %v259_v33 = vmul.f32 0.01, %v249_v32  ;;  %v357_v34 = vpop.f32.mrb[1].mxu1 }
 0x1d3   :  { %v252_v35 = vpop.f32.mrb[2].mxu1 }
 0x1d4   :  { %v261_v36 = vmax.f32 %v249_v32, %v259_v33  ;;  %v260_v37 = vmul.f32 0.01, %v252_v35  ;;  %v358_v38 = vpop.f32.mrb[3].mxu1 }
 0x1d6   :  { %v263_v39 = vsel %vm258_vm2, %v261_v36, %v249_v32  ;;  %v262_v40 = vmax.f32 %v252_v35, %v260_v37 }
 0x1d7   :  { %265 = vst [vmem:[#allocation2] sm:$0xff] %v263_v39 }
 0x1d8   :  { %v264_v41 = vsel %vm258_vm2, %v262_v40, %v252_v35 }
 0x1d9   :  { %266 = vst [vmem:[#allocation2 + $0x8] sm:$0xff] %v264_v41 }
 0x1da   :  { %394 = shalt.err (!%p391_p4)
}
 0x1db   :  { %s395_s27 = scalar_lea.hbm %s508_s4, 256 }
 0x1dc   :  { %p396_p5 = scmp.ne.s32.totalorder %s508_s4, %s395_s27  ;;  %p399_p6 = scmp.lt.u32.totalorder %s395_s27, %s508_s4 }
 0x1de   :  { %p401_p7 = pnand %p399_p6, %p396_p5 }
 0x1e0   :  { %404 = shalt.err (!%p401_p7)
}
 0x1e1   :  { %s411_s1 = smov 128   ;;  %s412_s6 = smov 8  }
 0x1e2   :  { %278 = dma.vmem_to_hbm [thread:$0]  %s273_s3, 256, %s508_s4, [#allocation3], %s411_s1, %s411_s1, %s412_s6  }
 0x1e3   :  { %405 = dma.done.wait [#allocation3], 256  }
 0x1e4   :  { %406 = vsyncadd [#allocation3], 4294967040 }
 0x1e5   :  { %282 = vsyncpa [#allocation3], 1 }

</bundles_post_ra>
